<compile_context>
chip_gen: v7x
topology: tpu7x:2x2x1
jax: 0.10.0
libtpu: 0.0.40
codegen_flags: <defaults>
</compile_context>

<pallas_src>
import functools

import jax
import jax.numpy as jnp
from jax import lax
from jax.experimental import pallas as pl
from jax.experimental.pallas import tpu as pltpu


def _round_up(x, m):
    return (x + m - 1) // m * m


def _cdiv(a, b):
    return -(-a // b)


def _vmem_capacity_bytes():
    # Per-generation VMEM (v5e/v6e: 128 MiB, v7x: 64 MiB).  Fall back to the
    # smallest (v7x) so a tile derived here never overflows a newer chip.
    try:
        return int(pltpu.get_tpu_info().vmem_capacity_bytes)
    except Exception:
        return 64 * 1024 * 1024


def _num_tensorcores():
    """TensorCores a single kernel can shard a "parallel" grid axis across."""
    try:
        info = pltpu.get_tpu_info()
        for name in ("num_cores", "core_count", "num_tensorcores",
                     "tensorcore_count", "num_tensor_cores"):
            v = getattr(info, name, None)
            if isinstance(v, int) and 1 <= v <= 8:
                return v
    except Exception:
        pass
    try:
        kind = jax.devices()[0].device_kind.lower().replace(" ", "")
    except Exception:
        return 1
    # Single-TensorCore devices first (the "v5"/"v6" substrings overlap).
    if any(s in kind for s in ("v2", "v3", "v5e", "v5lite", "v6e", "v6lite")):
        return 1
    # Megacore (v4 / v5p) and dual-TensorCore (v7x) chips.
    if any(s in kind for s in ("v4", "v5p", "v5", "v7", "7x")):
        return 2
    return 1


# ----------------------------------------------------------------------------
# Fused kernel.  Grid = (num_cores ["parallel"], steps_per_core ["arbitrary"]).
#   i == 0                    : zero this core's accumulator (+ BCE on core 0)
#   every step                : fori_loop over (8, hw) slabs of one row tile,
#                               VPU-accumulated into an (8, hw) f32 scratch
#   i == last                 : one cross-lane reduce -> this core's SMEM partial
# ----------------------------------------------------------------------------
def _fused_kernel(num_cores, grid_n, tile_rows, t8, rows, unroll,
                  needs_tile_guard, last_tile_ragged, lp_diff,
                  logits_ref, tcls_ref, ratio_ref,
                  pred_ref, label_ref, tw_ref,
                  bce_out_ref, mse_out_ref, acc_ref):
    c = pl.program_id(0)                      # TensorCore shard ("parallel")
    i = pl.program_id(1)                      # per-core row-tile step ("arbitrary")
    g = i * num_cores + c                     # global row-tile index (interleaved)

    @pl.when(i == 0)
    def _init():
        acc_ref[...] = jnp.zeros_like(acc_ref)
        bce_out_ref[0, 0] = jnp.float32(0.0)

    # ---- BCE-with-logits on the tiny (N, K) logits (piggybacks on core 0) --
    @pl.when(jnp.logical_and(i == 0, c == 0))
    def _bce():
        x = logits_ref[...].astype(jnp.float32)
        t = tcls_ref[...].astype(jnp.float32)
        r = ratio_ref[...].astype(jnp.float32)          # (1, K) broadcast over N
        w = jnp.exp((1.0 - t) * r + t * (1.0 - r))      # ratio2weight
        w = jnp.where(t > 1.0, 0.0, w)                  # weights[targets > 1] = 0
        bce = jnp.maximum(x, 0.0) - x * t + jnp.log1p(jnp.exp(-jnp.abs(x)))
        bce_out_ref[0, 0] = jnp.sum(w * bce)            # scaled to mean in wrapper

    # ---- target-weighted squared error, streamed as (8, hw) slabs -----------
    def _accumulate(mask_tail):
        def body(j, carry):
            off = pl.multiple_of(j * 8, 8)
            sl = pl.ds(off, 8)
            p = pred_ref[sl, :]
            l = label_ref[sl, :]
            if lp_diff:
                # bf16 subtraction (v6e/v7x): halves cast work, packed vregs.
                d = (p - l).astype(jnp.float32)
            else:
                d = p.astype(jnp.float32) - l.astype(jnp.float32)
            tw = tw_ref[sl, :].astype(jnp.float32)      # (8, 1) broadcast over hw
            sq = d * d * tw                             # (8, hw)
            if mask_tail:
                # Select (not multiply) so stale/NaN OOB rows can never leak.
                row = (g * tile_rows + j * 8
                       + lax.broadcasted_iota(jnp.int32, (8, 1), 0))
                sq = jnp.where(row < rows, sq, 0.0)
            acc_ref[...] += sq
            return carry
        lax.fori_loop(0, t8, body, 0, unroll=unroll)

    if last_tile_ragged:
        # Unmasked fast path for all full tiles; masked variant only on the
        # single tail tile; tiles with g >= grid_n (core padding) are skipped.
        @pl.when(g < grid_n - 1)
        def _full_tiles():
            _accumulate(False)

        @pl.when(g == grid_n - 1)
        def _tail_tile():
            _accumulate(True)
    elif needs_tile_guard:
        @pl.when(g < grid_n)
        def _guarded():
            _accumulate(False)
    else:
        _accumulate(False)

    @pl.when(i == pl.num_programs(1) - 1)
    def _fin():
        mse_out_ref[0, 0] = jnp.sum(acc_ref[...])       # this core's partial sum


def mask_pos_losses(pred_classes, pred_masks, label, target_weight, sample_weight,
                    low_precision_diff=False):
    """Returns (loss_bce_pos, loss_mask_pos) as f32 scalars."""
    N, K, H, W = pred_masks.shape
    # TODO(synk): F.interpolate bilinear resize when pred/label spatial shapes
    # differ is not implemented; shapes are assumed to match here.
    assert label.shape == pred_masks.shape
    rows, hw = N * K, H * W

    logits = pred_classes.reshape(N, K)                 # (N, K, 1) -> (N, K)
    tcls = target_weight.reshape(N, K)
    ratio = jnp.asarray(sample_weight, dtype=jnp.float32).reshape(1, K)

    # 2-D views only (no jnp.pad HBM copy); ragged tail is masked in-kernel.
    pred2 = pred_masks.reshape(rows, hw)
    label2 = label.reshape(rows, hw)
    tw2 = target_weight.reshape(rows, 1)

    # ---- tile sizing: bytes-based, VMEM- and temporary-aware ----------------
    ps, ls, ts = (pred_masks.dtype.itemsize, label.dtype.itemsize,
                  target_weight.dtype.itemsize)
    row_hbm = hw * (ps + ls) + ts                  # HBM bytes streamed per row
    row_vmem = hw * (ps + ls) + 128 * ts           # VMEM bytes per row per pipeline buf
    cap = _vmem_capacity_bytes()
    vmem_limit = int(min(cap * 3 // 4, 96 * 1024 * 1024))   # 96 MiB v5e/v6e, 48 MiB v7x
    # Double-buffered streamed inputs capped at ~60% of the limit; the rest is
    # headroom for the (8, hw) accumulator, per-slab f32 temps, compiler scratch.
    max_rows_vmem = (vmem_limit * 6 // 10) // max(2 * row_vmem, 1)
    max_rows_step = (16 * 1024 * 1024) // max(row_hbm, 1)   # ~16 MiB HBM / grid step
    tile_rows = max(8, (min(max_rows_vmem, max_rows_step) // 8) * 8)
    tile_rows = min(tile_rows, _round_up(rows, 8))
    # TODO(synk): if hw were so large that even an 8-row tile overflows VMEM the
    # hw axis itself would need tiling; pose heatmaps are far below that.
    t8 = tile_rows // 8
    grid_n = _cdiv(rows, tile_rows)

    num_cores = max(1, min(_num_tensorcores(), grid_n))
    steps = _cdiv(grid_n, num_cores)
    needs_tile_guard = steps * num_cores != grid_n       # some (core, step) have no tile
    last_tile_ragged = (rows % tile_rows) != 0           # last tile over-reads rows
    unroll = t8 if t8 <= 8 else 8
    lp_diff = (bool(low_precision_diff) and pred_masks.dtype == label.dtype
               and pred_masks.dtype != jnp.float32)

    def hm_index(c, i):
        g = i * num_cores + c
        if needs_tile_guard:
            g = jnp.minimum(g, grid_n - 1)   # clamp DMA of skipped over-run tiles
        return (g, 0)

    kernel = functools.partial(
        _fused_kernel, num_cores, grid_n, tile_rows, t8, rows, unroll,
        needs_tile_guard, last_tile_ragged, lp_diff)

    bce_parts, mse_parts = pl.pallas_call(
        kernel,
        out_shape=(jax.ShapeDtypeStruct((num_cores, 1), jnp.float32),
                   jax.ShapeDtypeStruct((num_cores, 1), jnp.float32)),
        grid_spec=pltpu.PrefetchScalarGridSpec(
            num_scalar_prefetch=0,
            grid=(num_cores, steps),
            in_specs=[
                pl.BlockSpec((N, K), lambda c, i: (0, 0)),        # logits (resident)
                pl.BlockSpec((N, K), lambda c, i: (0, 0)),        # class targets
                pl.BlockSpec((1, K), lambda c, i: (0, 0)),        # sample-weight ratio
                pl.BlockSpec((tile_rows, hw), hm_index),          # pred heatmaps
                pl.BlockSpec((tile_rows, hw), hm_index),          # label heatmaps
                pl.BlockSpec((tile_rows, 1), hm_index),           # target_weight tile
            ],
            out_specs=(
                pl.BlockSpec((1, 1), lambda c, i: (c, 0),
                             memory_space=pltpu.MemorySpace.SMEM),
                pl.BlockSpec((1, 1), lambda c, i: (c, 0),
                             memory_space=pltpu.MemorySpace.SMEM),
            ),
            scratch_shapes=[pltpu.VMEM((8, hw), jnp.float32)],
        ),
        # TODO(synk): if hw is not a multiple of 128 the lane dim is ragged
        # (minor vld/VALU waste); padding hw once at reshape time could recover it.
        compiler_params=pltpu.CompilerParams(
            dimension_semantics=("parallel", "arbitrary"),
            vmem_limit_bytes=vmem_limit),
    )(logits, tcls, ratio, pred2, label2, tw2)

    loss_bce = bce_parts[0, 0] * jnp.float32(1.0 / (N * K))
    loss_mse = jnp.sum(mse_parts) * jnp.float32(1.0 / (rows * hw))
    return loss_bce, loss_mse


# ----------------------------------------------------------------------------
# Criterion wrapper (mirrors MaskPOSSetCriterion.forward)
# ----------------------------------------------------------------------------
class MaskPOSSetCriterion:
    def __init__(self, num_classes, matcher, weight_dict, losses, ginfo,
                 sample_weight=None, eos_coef=0.1, aux=False, ignore_blank=True,
                 low_precision_diff=False):
        self.num_classes = num_classes
        self.matcher = matcher
        self.weight_dict = weight_dict
        self.eos_coef = eos_coef
        self.losses = losses
        self.sample_weight = jnp.asarray(sample_weight, dtype=jnp.float32)
        self.aux = aux
        self.ignore_blank = ignore_blank
        self.ginfo = ginfo
        self.low_precision_diff = low_precision_diff

    def forward(self, outputs, targets):
        # Hungarian matcher is invoked but its indices are unused by POS losses.
        _ = self.matcher(outputs, targets)
        losses = {}
        want_bce = 'pos_bce_labels' in self.losses
        want_mask = 'pos_mask' in self.losses
        if want_bce or want_mask:
            # Both losses come out of one fused pallas_call.
            bce, mse = mask_pos_losses(
                outputs['pred_classes'], outputs['pred_masks'],
                targets['label'], targets['target_weight'], self.sample_weight,
                low_precision_diff=self.low_precision_diff)
            if want_bce:
                losses['loss_bce_pos'] = bce
            if want_mask:
                losses['loss_mask_pos'] = mse
                # TODO(synk): 'top1' uses pose_pck_accuracy (host-side numpy PCK
                # metric under no_grad); no Pallas equivalent, omitted.
        return losses

    __call__ = forward


# ----------------------------------------------------------------------------
# Pure-JAX reference for verification
# ----------------------------------------------------------------------------
def _ref_losses(outputs, targets, sample_weight):
    x = outputs['pred_classes'].astype(jnp.float32).squeeze(-1)
    t = targets['target_weight'].astype(jnp.float32).squeeze(-1)
    r = sample_weight.reshape(1, -1)
    w = jnp.exp((1.0 - t) * r + t * (1.0 - r))
    w = jnp.where(t > 1.0, 0.0, w)
    bce = jnp.maximum(x, 0.0) - x * t + jnp.log1p(jnp.exp(-jnp.abs(x)))
    loss_bce = jnp.mean(w * bce)

    pred = outputs['pred_masks'].astype(jnp.float32)
    label = targets['label'].astype(jnp.float32)
    tw = targets['target_weight'].astype(jnp.float32)[..., None]  # (N,K,1,1)
    loss_mse = jnp.mean((pred - label) ** 2 * tw)
    return loss_bce, loss_mse


def _run_case(N, K, H, W, seed):
    key = jax.random.PRNGKey(seed)
    k1, k2, k3, k4 = jax.random.split(key, 4)
    outputs = {
        'pred_classes': jax.random.normal(k1, (N, K, 1), dtype=jnp.float32),
        'pred_masks': jax.random.normal(k2, (N, K, H, W), dtype=jnp.float32),
    }
    targets = {
        'target_weight': (jax.random.uniform(k3, (N, K, 1)) > 0.3).astype(jnp.float32),
        'label': jax.random.uniform(k4, (N, K, H, W), dtype=jnp.float32),
    }
    sample_weight = jnp.linspace(0.1, 0.9, K, dtype=jnp.float32)

    criterion = MaskPOSSetCriterion(
        num_classes=K,
        matcher=lambda o, t: None,            # matcher indices unused by POS losses
        weight_dict={'loss_bce_pos': 1.0, 'loss_mask_pos': 1.0},
        losses=['pos_bce_labels', 'pos_mask'],
        ginfo=None,
        sample_weight=sample_weight,
    )
    losses = criterion(outputs, targets)
    losses = jax.tree_util.tree_map(jax.block_until_ready, losses)

    ref_bce, ref_mse = _ref_losses(outputs, targets, sample_weight)
    assert jnp.allclose(losses['loss_bce_pos'], ref_bce, rtol=1e-5, atol=1e-6), (
        (N, K, H, W), losses['loss_bce_pos'], ref_bce)
    assert jnp.allclose(losses['loss_mask_pos'], ref_mse, rtol=1e-5, atol=1e-6), (
        (N, K, H, W), losses['loss_mask_pos'], ref_mse)


if __name__ == "__main__":
    # Case A: rows divisible by 8 (pure fast path).  N=2 batch, K=16 keypoints,
    # 16x16 heatmaps.
    _run_case(N=2, K=16, H=16, W=16, seed=0)
    # Case B: ragged rows (N*K = 51, not a multiple of 8 or of the tile) to
    # exercise the in-kernel tail-row select path.
    _run_case(N=3, K=17, H=8, W=8, seed=1)

    print("KERNEL_OK")
</pallas_src>

<mosaic_0001>
module attributes {stable_mosaic.version = 11 : i64} {
  func.func @_fused_kernel(%arg0: i32, %arg1: i32, %arg2: memref<2x16xf32, #tpu.memory_space<vmem>>, %arg3: memref<2x16xf32, #tpu.memory_space<vmem>>, %arg4: memref<1x16xf32, #tpu.memory_space<vmem>>, %arg5: memref<32x256xf32, #tpu.memory_space<vmem>>, %arg6: memref<32x256xf32, #tpu.memory_space<vmem>>, %arg7: memref<32x1xf32, #tpu.memory_space<vmem>>, %arg8: memref<1x1xf32, #tpu.memory_space<smem>>, %arg9: memref<1x1xf32, #tpu.memory_space<smem>>, %arg10: memref<8x256xf32, #tpu.memory_space<vmem>>) attributes {dimension_semantics = [#tpu.dimension_semantics<parallel>, #tpu.dimension_semantics<arbitrary>], iteration_bounds = array<i64: 1, 1>, scalar_prefetch = 0 : i64, scratch_operands = 1 : i64, tpu.core_type = #tpu.core_type<tc>, window_params = [{pipeline_mode = #tpu.pipeline_mode<synchronous>, transform_indices = @transform_0, window_bounds = array<i64: 2, 16>}, {pipeline_mode = #tpu.pipeline_mode<synchronous>, transform_indices = @transform_1, window_bounds = array<i64: 2, 16>}, {pipeline_mode = #tpu.pipeline_mode<synchronous>, transform_indices = @transform_2, window_bounds = array<i64: 1, 16>}, {transform_indices = @transform_3, window_bounds = array<i64: 32, 256>}, {transform_indices = @transform_4, window_bounds = array<i64: 32, 256>}, {transform_indices = @transform_5, window_bounds = array<i64: 32, 1>}, {transform_indices = @transform_6, window_bounds = array<i64: 1, 1>}, {transform_indices = @transform_7, window_bounds = array<i64: 1, 1>}]} {
    %c0_i32 = arith.constant 0 : i32
    %0 = arith.cmpi eq, %arg1, %c0_i32 : i32
    %1 = arith.extui %0 : i1 to i32
    %c0_i32_0 = arith.constant 0 : i32
    %2 = arith.cmpi ne, %1, %c0_i32_0 : i32
    scf.if %2 {
      %cst = arith.constant 0.000000e+00 : f32
      %71 = vector.broadcast %cst : f32 to vector<8x256xf32>
      %c0_37 = arith.constant 0 : index
      %c0_38 = arith.constant 0 : index
      %72 = vector.load %arg10[%c0_37, %c0_38] : memref<8x256xf32, #tpu.memory_space<vmem>>, vector<8x256xf32>
      tpu.vector_store %arg10[%c0_37, %c0_38], %71 {strides = array<i32>} : memref<8x256xf32, #tpu.memory_space<vmem>>, vector<8x256xf32>,
      %cst_39 = arith.constant 0.000000e+00 : f32
      %c0_40 = arith.constant 0 : index
      %c0_41 = arith.constant 0 : index
      %73 = memref.load %arg8[%c0_40, %c0_41] : memref<1x1xf32, #tpu.memory_space<smem>>
      memref.store %cst_39, %arg8[%c0_40, %c0_41] : memref<1x1xf32, #tpu.memory_space<smem>>
    } else {
    }
    %c0_i32_1 = arith.constant 0 : i32
    %3 = arith.cmpi eq, %arg1, %c0_i32_1 : i32
    %c0_i32_2 = arith.constant 0 : i32
    %4 = arith.cmpi eq, %arg0, %c0_i32_2 : i32
    %5 = arith.andi %3, %4 : i1
    %6 = arith.extui %5 : i1 to i32
    %c0_i32_3 = arith.constant 0 : i32
    %7 = arith.cmpi ne, %6, %c0_i32_3 : i32
    scf.if %7 {
      %c0_37 = arith.constant 0 : index
      %c0_38 = arith.constant 0 : index
      %71 = vector.load %arg2[%c0_37, %c0_38] : memref<2x16xf32, #tpu.memory_space<vmem>>, vector<2x16xf32>
      %c0_39 = arith.constant 0 : index
      %c0_40 = arith.constant 0 : index
      %72 = vector.load %arg3[%c0_39, %c0_40] : memref<2x16xf32, #tpu.memory_space<vmem>>, vector<2x16xf32>
      %c0_41 = arith.constant 0 : index
      %c0_42 = arith.constant 0 : index
      %73 = vector.load %arg4[%c0_41, %c0_42] : memref<1x16xf32, #tpu.memory_space<vmem>>, vector<1x16xf32>
      %cst = arith.constant 1.000000e+00 : f32
      %74 = vector.broadcast %cst : f32 to vector<2x16xf32>
      %75 = arith.subf %74, %72 : vector<2x16xf32>
      %76 = vector.broadcast %73 : vector<1x16xf32> to vector<2x16xf32>
      %77 = arith.mulf %75, %76 : vector<2x16xf32>
      %cst_43 = arith.constant 1.000000e+00 : f32
      %78 = vector.broadcast %cst_43 : f32 to vector<1x16xf32>
      %79 = arith.subf %78, %73 : vector<1x16xf32>
      %80 = vector.broadcast %79 : vector<1x16xf32> to vector<2x16xf32>
      %81 = arith.mulf %72, %80 : vector<2x16xf32>
      %82 = arith.addf %77, %81 : vector<2x16xf32>
      %83 = math.exp %82 : vector<2x16xf32>
      %cst_44 = arith.constant 1.000000e+00 : f32
      %84 = vector.broadcast %cst_44 : f32 to vector<2x16xf32>
      %85 = arith.cmpf ogt, %72, %84 : vector<2x16xf32>
      %cst_45 = arith.constant 0.000000e+00 : f32
      %86 = vector.broadcast %cst_45 : f32 to vector<2x16xf32>
      %87 = arith.select %85, %86, %83 : vector<2x16xi1>, vector<2x16xf32>
      %cst_46 = arith.constant 0.000000e+00 : f32
      %88 = vector.broadcast %cst_46 : f32 to vector<2x16xf32>
      %89 = arith.maximumf %71, %88 : vector<2x16xf32>
      %90 = arith.mulf %71, %72 : vector<2x16xf32>
      %91 = arith.subf %89, %90 : vector<2x16xf32>
      %92 = math.absf %71 : vector<2x16xf32>
      %cst_47 = arith.constant 0.000000e+00 : f32
      %93 = vector.broadcast %cst_47 : f32 to vector<2x16xf32>
      %94 = arith.subf %93, %92 : vector<2x16xf32>
      %95 = math.exp %94 : vector<2x16xf32>
      %96 = math.log1p %95 : vector<2x16xf32>
      %97 = arith.addf %91, %96 : vector<2x16xf32>
      %98 = arith.mulf %87, %97 : vector<2x16xf32>
      %99 = vector.shape_cast %98 : vector<2x16xf32> to vector<1x2x16xf32>
      %cst_48 = arith.constant dense<0.000000e+00> : vector<1xf32>
      %100 = vector.multi_reduction <add>, %99, %cst_48 [1, 2] : vector<1x2x16xf32> to vector<1xf32>
      %101 = vector.shape_cast %100 : vector<1xf32> to vector<1x1x1xf32>
      %102 = vector.extract %101[0, 0, 0] : f32 from vector<1x1x1xf32>
      %c0_49 = arith.constant 0 : index
      %c0_50 = arith.constant 0 : index
      %103 = memref.load %arg8[%c0_49, %c0_50] : memref<1x1xf32, #tpu.memory_space<smem>>
      memref.store %102, %arg8[%c0_49, %c0_50] : memref<1x1xf32, #tpu.memory_space<smem>>
    } else {
    }
    %c0_i32_4 = arith.constant 0 : i32
    %c8_i32 = arith.constant 8 : i32
    %8 = arith.muli %c0_i32_4, %c8_i32 : i32
    %9 = tpu.assume_multiple %8, 8 : i32
    %10 = arith.index_cast %9 : i32 to index
    %c0 = arith.constant 0 : index
    %11 = vector.load %arg5[%10, %c0] : memref<32x256xf32, #tpu.memory_space<vmem>>, vector<8x256xf32>
    %12 = arith.index_cast %9 : i32 to index
    %c0_5 = arith.constant 0 : index
    %13 = vector.load %arg6[%12, %c0_5] : memref<32x256xf32, #tpu.memory_space<vmem>>, vector<8x256xf32>
    %14 = arith.subf %11, %13 : vector<8x256xf32>
    %15 = arith.index_cast %9 : i32 to index
    %c0_6 = arith.constant 0 : index
    %16 = vector.load %arg7[%15, %c0_6] : memref<32x1xf32, #tpu.memory_space<vmem>>, vector<8x1xf32>
    %17 = arith.mulf %14, %14 : vector<8x256xf32>
    %18 = vector.broadcast %16 : vector<8x1xf32> to vector<8x256xf32>
    %19 = arith.mulf %17, %18 : vector<8x256xf32>
    %c0_7 = arith.constant 0 : index
    %c0_8 = arith.constant 0 : index
    %20 = vector.load %arg10[%c0_7, %c0_8] : memref<8x256xf32, #tpu.memory_space<vmem>>, vector<8x256xf32>
    %21 = arith.addf %20, %19 : vector<8x256xf32>
    %c0_9 = arith.constant 0 : index
    %c0_10 = arith.constant 0 : index
    %22 = vector.load %arg10[%c0_9, %c0_10] : memref<8x256xf32, #tpu.memory_space<vmem>>, vector<8x256xf32>
    tpu.vector_store %arg10[%c0_9, %c0_10], %21 {strides = array<i32>} : memref<8x256xf32, #tpu.memory_space<vmem>>, vector<8x256xf32>,
    %c1_i32 = arith.constant 1 : i32
    %c8_i32_11 = arith.constant 8 : i32
    %23 = arith.muli %c1_i32, %c8_i32_11 : i32
    %24 = tpu.assume_multiple %23, 8 : i32
    %25 = arith.index_cast %24 : i32 to index
    %c0_12 = arith.constant 0 : index
    %26 = vector.load %arg5[%25, %c0_12] : memref<32x256xf32, #tpu.memory_space<vmem>>, vector<8x256xf32>
    %27 = arith.index_cast %24 : i32 to index
    %c0_13 = arith.constant 0 : index
    %28 = vector.load %arg6[%27, %c0_13] : memref<32x256xf32, #tpu.memory_space<vmem>>, vector<8x256xf32>
    %29 = arith.subf %26, %28 : vector<8x256xf32>
    %30 = arith.index_cast %24 : i32 to index
    %c0_14 = arith.constant 0 : index
    %31 = vector.load %arg7[%30, %c0_14] : memref<32x1xf32, #tpu.memory_space<vmem>>, vector<8x1xf32>
    %32 = arith.mulf %29, %29 : vector<8x256xf32>
    %33 = vector.broadcast %31 : vector<8x1xf32> to vector<8x256xf32>
    %34 = arith.mulf %32, %33 : vector<8x256xf32>
    %c0_15 = arith.constant 0 : index
    %c0_16 = arith.constant 0 : index
    %35 = vector.load %arg10[%c0_15, %c0_16] : memref<8x256xf32, #tpu.memory_space<vmem>>, vector<8x256xf32>
    %36 = arith.addf %35, %34 : vector<8x256xf32>
    %c0_17 = arith.constant 0 : index
    %c0_18 = arith.constant 0 : index
    %37 = vector.load %arg10[%c0_17, %c0_18] : memref<8x256xf32, #tpu.memory_space<vmem>>, vector<8x256xf32>
    tpu.vector_store %arg10[%c0_17, %c0_18], %36 {strides = array<i32>} : memref<8x256xf32, #tpu.memory_space<vmem>>, vector<8x256xf32>,
    %c2_i32 = arith.constant 2 : i32
    %c8_i32_19 = arith.constant 8 : i32
    %38 = arith.muli %c2_i32, %c8_i32_19 : i32
    %39 = tpu.assume_multiple %38, 8 : i32
    %40 = arith.index_cast %39 : i32 to index
    %c0_20 = arith.constant 0 : index
    %41 = vector.load %arg5[%40, %c0_20] : memref<32x256xf32, #tpu.memory_space<vmem>>, vector<8x256xf32>
    %42 = arith.index_cast %39 : i32 to index
    %c0_21 = arith.constant 0 : index
    %43 = vector.load %arg6[%42, %c0_21] : memref<32x256xf32, #tpu.memory_space<vmem>>, vector<8x256xf32>
    %44 = arith.subf %41, %43 : vector<8x256xf32>
    %45 = arith.index_cast %39 : i32 to index
    %c0_22 = arith.constant 0 : index
    %46 = vector.load %arg7[%45, %c0_22] : memref<32x1xf32, #tpu.memory_space<vmem>>, vector<8x1xf32>
    %47 = arith.mulf %44, %44 : vector<8x256xf32>
    %48 = vector.broadcast %46 : vector<8x1xf32> to vector<8x256xf32>
    %49 = arith.mulf %47, %48 : vector<8x256xf32>
    %c0_23 = arith.constant 0 : index
    %c0_24 = arith.constant 0 : index
    %50 = vector.load %arg10[%c0_23, %c0_24] : memref<8x256xf32, #tpu.memory_space<vmem>>, vector<8x256xf32>
    %51 = arith.addf %50, %49 : vector<8x256xf32>
    %c0_25 = arith.constant 0 : index
    %c0_26 = arith.constant 0 : index
    %52 = vector.load %arg10[%c0_25, %c0_26] : memref<8x256xf32, #tpu.memory_space<vmem>>, vector<8x256xf32>
    tpu.vector_store %arg10[%c0_25, %c0_26], %51 {strides = array<i32>} : memref<8x256xf32, #tpu.memory_space<vmem>>, vector<8x256xf32>,
    %c3_i32 = arith.constant 3 : i32
    %c8_i32_27 = arith.constant 8 : i32
    %53 = arith.muli %c3_i32, %c8_i32_27 : i32
    %54 = tpu.assume_multiple %53, 8 : i32
    %55 = arith.index_cast %54 : i32 to index
    %c0_28 = arith.constant 0 : index
    %56 = vector.load %arg5[%55, %c0_28] : memref<32x256xf32, #tpu.memory_space<vmem>>, vector<8x256xf32>
    %57 = arith.index_cast %54 : i32 to index
    %c0_29 = arith.constant 0 : index
    %58 = vector.load %arg6[%57, %c0_29] : memref<32x256xf32, #tpu.memory_space<vmem>>, vector<8x256xf32>
    %59 = arith.subf %56, %58 : vector<8x256xf32>
    %60 = arith.index_cast %54 : i32 to index
    %c0_30 = arith.constant 0 : index
    %61 = vector.load %arg7[%60, %c0_30] : memref<32x1xf32, #tpu.memory_space<vmem>>, vector<8x1xf32>
    %62 = arith.mulf %59, %59 : vector<8x256xf32>
    %63 = vector.broadcast %61 : vector<8x1xf32> to vector<8x256xf32>
    %64 = arith.mulf %62, %63 : vector<8x256xf32>
    %c0_31 = arith.constant 0 : index
    %c0_32 = arith.constant 0 : index
    %65 = vector.load %arg10[%c0_31, %c0_32] : memref<8x256xf32, #tpu.memory_space<vmem>>, vector<8x256xf32>
    %66 = arith.addf %65, %64 : vector<8x256xf32>
    %c0_33 = arith.constant 0 : index
    %c0_34 = arith.constant 0 : index
    %67 = vector.load %arg10[%c0_33, %c0_34] : memref<8x256xf32, #tpu.memory_space<vmem>>, vector<8x256xf32>
    tpu.vector_store %arg10[%c0_33, %c0_34], %66 {strides = array<i32>} : memref<8x256xf32, #tpu.memory_space<vmem>>, vector<8x256xf32>,
    %c4_i32 = arith.constant 4 : i32
    %c0_i32_35 = arith.constant 0 : i32
    %68 = arith.cmpi eq, %arg1, %c0_i32_35 : i32
    %69 = arith.extui %68 : i1 to i32
    %c0_i32_36 = arith.constant 0 : i32
    %70 = arith.cmpi ne, %69, %c0_i32_36 : i32
    scf.if %70 {
      %c0_37 = arith.constant 0 : index
      %c0_38 = arith.constant 0 : index
      %71 = vector.load %arg10[%c0_37, %c0_38] : memref<8x256xf32, #tpu.memory_space<vmem>>, vector<8x256xf32>
      %72 = vector.shape_cast %71 : vector<8x256xf32> to vector<1x8x256xf32>
      %cst = arith.constant dense<0.000000e+00> : vector<1xf32>
      %73 = vector.multi_reduction <add>, %72, %cst [1, 2] : vector<1x8x256xf32> to vector<1xf32>
      %74 = vector.shape_cast %73 : vector<1xf32> to vector<1x1x1xf32>
      %75 = vector.extract %74[0, 0, 0] : f32 from vector<1x1x1xf32>
      %c0_39 = arith.constant 0 : index
      %c0_40 = arith.constant 0 : index
      %76 = memref.load %arg9[%c0_39, %c0_40] : memref<1x1xf32, #tpu.memory_space<smem>>
      memref.store %75, %arg9[%c0_39, %c0_40] : memref<1x1xf32, #tpu.memory_space<smem>>
    } else {
    }
    return
  }
  func.func @transform_0(%arg0: i32, %arg1: i32) -> (i32, i32) {
    %c0_i32 = arith.constant 0 : i32
    %c0_i32_0 = arith.constant 0 : i32
    %c0_i32_1 = arith.constant 0 : i32
    return %c0_i32, %c0_i32_0 : i32, i32
  }
  func.func @transform_1(%arg0: i32, %arg1: i32) -> (i32, i32) {
    %c0_i32 = arith.constant 0 : i32
    %c0_i32_0 = arith.constant 0 : i32
    %c0_i32_1 = arith.constant 0 : i32
    return %c0_i32, %c0_i32_0 : i32, i32
  }
  func.func @transform_2(%arg0: i32, %arg1: i32) -> (i32, i32) {
    %c0_i32 = arith.constant 0 : i32
    %c0_i32_0 = arith.constant 0 : i32
    %c0_i32_1 = arith.constant 0 : i32
    return %c0_i32, %c0_i32_0 : i32, i32
  }
  func.func @transform_3(%arg0: i32, %arg1: i32) -> (i32, i32) {
    %c1_i32 = arith.constant 1 : i32
    %0 = arith.muli %arg1, %c1_i32 : i32
    %1 = arith.addi %0, %arg0 : i32
    %c0_i32 = arith.constant 0 : i32
    %c0_i32_0 = arith.constant 0 : i32
    return %1, %c0_i32 : i32, i32
  }
  func.func @transform_4(%arg0: i32, %arg1: i32) -> (i32, i32) {
    %c1_i32 = arith.constant 1 : i32
    %0 = arith.muli %arg1, %c1_i32 : i32
    %1 = arith.addi %0, %arg0 : i32
    %c0_i32 = arith.constant 0 : i32
    %c0_i32_0 = arith.constant 0 : i32
    return %1, %c0_i32 : i32, i32
  }
  func.func @transform_5(%arg0: i32, %arg1: i32) -> (i32, i32) {
    %c1_i32 = arith.constant 1 : i32
    %0 = arith.muli %arg1, %c1_i32 : i32
    %1 = arith.addi %0, %arg0 : i32
    %c0_i32 = arith.constant 0 : i32
    %c0_i32_0 = arith.constant 0 : i32
    return %1, %c0_i32 : i32, i32
  }
  func.func @transform_6(%arg0: i32, %arg1: i32) -> (i32, i32) {
    %c0_i32 = arith.constant 0 : i32
    %c0_i32_0 = arith.constant 0 : i32
    return %arg0, %c0_i32 : i32, i32
  }
  func.func @transform_7(%arg0: i32, %arg1: i32) -> (i32, i32) {
    %c0_i32 = arith.constant 0 : i32
    %c0_i32_0 = arith.constant 0 : i32
    return %arg0, %c0_i32 : i32, i32
  }
}

</mosaic_0001>

<bundles_post_ra>
// kernel: tpu_custom_call.1
= control target key start
LH: loop header
LB: loop body
LE: loop exit
PB: predicated region body
PF: predicated region fallthrough
CT: control target
= control target key end

     0   :  { %13 = vsyncpa [#allocation4], 0  ;;  %s537_s0 = inlined_call_operand.vmem [shape: f32[2,16], index: 0, kind: input, shape index: {}]   ;;  %s538_s1 = inlined_call_operand.vmem [shape: f32[2,16], index: 1, kind: input, shape index: {}]   ;;  %s539_s2 = inlined_call_operand.vmem [shape: f32[1,16], index: 2, kind: input, shape index: {}]   ;;  %s540_s3 = inlined_call_operand.hbm [shape: f32[32,256], index: 3, kind: input, shape index: {}]   ;;  %s541_s4 = inlined_call_operand.hbm [shape: f32[32,256], index: 4, kind: input, shape index: {}]   ;;  %s542_s5 = inlined_call_operand.vmem [shape: f32[32,1], index: 5, kind: input, shape index: {}]   ;;  %s543_s6 = inlined_call_operand.hbm [shape: f32[1,1], index: 6, kind: output, shape index: {0}]   ;;  %s544_s7 = inlined_call_operand.hbm [shape: f32[1,1], index: 7, kind: output, shape index: {1}]  }
   0x1   :  { %14 = vsyncpa [#allocation7], 0 }
   0x2   :  { %15 = vsyncpa [#allocation5], 0 }
   0x3   :  { %16 = vsyncpa [#allocation10], 0  ;;  %s421_s24 = smov [#allocation3]   ;;  %s349_s28 = scalar_lea.hbm %s540_s3, 1024 }
   0x4   :  { %s33_s25 = sshll.u32 %s421_s24, 4  ;;  %p350_p0 = scmp.ne.s32.totalorder %s540_s3, %s349_s28  ;;  %s34_s25 = int_to_ptr.vmem [resolvable:$true] %s33_s25 }
   0x5   :  { %p353_p1 = scmp.lt.u32.totalorder %s349_s28, %s540_s3 }
   0x7   :  { %p355_p2 = pnand %p353_p1, %p350_p0 }
   0x9   :  { %358 = shalt.err (!%p355_p2)
}
   0xa   :  { %s359_s10 = scalar_lea.vmem %s34_s25, 1024  ;;  %p364_p4 = scmp.lt.s32.totalorder %s34_s25, %s34_s25 }
   0xb   :  { %p360_p3 = scmp.ne.s32.totalorder %s34_s25, %s359_s10  ;;  %p365_p5 = scmp.lt.s32.totalorder %s359_s10, %s359_s10 }
   0xd   :  { %p366_p6 = por %p365_p5, %p364_p4 }
   0xf   :  { %p367_p7 = pnand %p366_p6, %p360_p3 }
  0x11   :  { %370 = shalt.err (!%p367_p7)
}
  0x12   :  { %s422_s11 = smov 256   ;;  %s423_s12 = smov 16  }
  0x13   :  { %39 = dma.hbm_to_vmem [thread:$0]  %s540_s3, 1024, %s34_s25, [#allocation4], %s422_s11, %s422_s11, %s423_s12  }
  0x14   :  { %s424_s15 = smov [#allocation6]   ;;  %s371_s19 = scalar_lea.hbm %s541_s4, 1024 }
  0x15   :  { %s50_s16 = sshll.u32 %s424_s15, 4  ;;  %p372_p8 = scmp.ne.s32.totalorder %s541_s4, %s371_s19  ;;  %s51_s16 = int_to_ptr.vmem [resolvable:$true] %s50_s16 }
  0x16   :  { %p375_p9 = scmp.lt.u32.totalorder %s371_s19, %s541_s4 }
  0x18   :  { %p377_p10 = pnand %p375_p9, %p372_p8 }
  0x1a   :  { %380 = shalt.err (!%p377_p10)
}
  0x1b   :  { %s381_s24 = scalar_lea.vmem %s51_s16, 1024  ;;  %p386_p12 = scmp.lt.s32.totalorder %s51_s16, %s51_s16 }
  0x1c   :  { %p382_p11 = scmp.ne.s32.totalorder %s51_s16, %s381_s24  ;;  %p387_p13 = scmp.lt.s32.totalorder %s381_s24, %s381_s24 }
  0x1e   :  { %p388_p0 = por %p387_p13, %p386_p12 }
  0x20   :  { %p389_p1 = pnand %p388_p0, %p382_p11 }
  0x22   :  { %392 = shalt.err (!%p389_p1)
}
  0x23   :  { %56 = dma.hbm_to_vmem [thread:$0]  %s541_s4, 1024, %s51_s16, [#allocation7], %s422_s11, %s422_s11, %s423_s12  }
  0x24   :  { %413 = dma.done.wait [#allocation4], 1024  }
  0x25   :  { %414 = vsyncadd [#allocation4], 4294966272 }
  0x26   :  { %415 = dma.done.wait [#allocation7], 1024  }
  0x27   :  { %416 = vsyncadd [#allocation7], 4294966272  ;;  %v425_v0 = vmov 0   ;;  %v327_v1 = vld [vmem:[%s542_s5 + $0x10] sm:$0xff]  ;;  %v170_v2 = vld [vmem:[%s542_s5] sm:$0xff]  ;;  %v109_v3 = vlaneseq  ;;  %vm146_vm2 = vcmask 123904  }
  0x28   :  { %342 = vset.pattern.permute.xlu1 %v425_v0  ;;  %341 = vset.pattern.permute.xlu0 %v425_v0  ;;  %v328_v4 = vld [vmem:[%s542_s5 + $0x18] sm:$0xff]  ;;  %v326_v5 = vld [vmem:[%s542_s5 + $0x8] sm:$0xff]  ;;  %v104_v7 = vld [vmem:[%s537_s0] sm:$0x3]  ;;  %s393_s5 = scalar_lea.hbm %s543_s6, 16 }
  0x29   :  { %231 = vperm.xlu1 %342, %v327_v1   ;;  %175 = vperm.xlu0 %341, %v170_v2   ;;  %v110_v6 = vshrl.u32 %v109_v3, 7  ;;  %v106_v8 = vld [vmem:[%s539_s2] sm:$0x1]  ;;  %v131_v12 = vand.u32 2147483647, %v104_v7  ;;  %v128_v26 = vmax.f32 %v104_v7, 0.0  ;;  %p394_p2 = scmp.ne.s32.totalorder %s543_s6, %s393_s5  ;;  %p397_p3 = scmp.lt.u32.totalorder %s393_s5, %s543_s6 }
  0x2a   :  { %v115_v10 = vsub.f32 1.0, %v106_v8  ;;  %v105_v11 = vld [vmem:[%s538_s1] sm:$0x3]  ;;  %v163_v40 = vld [vmem:[#allocation3 + $0x8] sm:$0xff]  ;;  %v189_v43 = vld [vmem:[#allocation3 + $0x10] sm:$0xff] }
  0x2b   :  { %v111_v9 = vsub.s32 0, %v110_v6  ;;  %v107_v13 = vsub.f32 1.0, %v105_v11  ;;  %v132_v16 = vsub.f32 0.0, %v131_v12  ;;  %v129_v27 = vmul.f32 %v105_v11, %v104_v7  ;;  %v162_v39 = vld [vmem:[#allocation3] sm:$0xff]  ;;  %v167_v42 = vld [vmem:[#allocation6 + $0x8] sm:$0xff]  ;;  %v190_v44 = vld [vmem:[#allocation3 + $0x18] sm:$0xff]  ;;  %p399_p4 = pnand %p397_p3, %p394_p2 }
  0x2c   :  { %vm126_vm0 = vcmp.gt.f32.partialorder %v105_v11, 1.0  ;;  %v166_v41 = vld [vmem:[#allocation6] sm:$0xff]  ;;  %v193_v45 = vld [vmem:[#allocation6 + $0x10] sm:$0xff]  ;;  %v194_v46 = vld [vmem:[#allocation6 + $0x18] sm:$0xff]  ;;  %v169_v53 = vsub.f32 %v163_v40, %v167_v42 }
  0x2d   :  { %259 = vperm.xlu1 %342, %v328_v4   ;;  %203 = vperm.xlu0 %341, %v326_v5   ;;  %v112_v14 = vrot.slane %v106_v8, %v111_v9  ;;  %v120_v15 = vrot.slane %v115_v10, %v111_v9  ;;  %v133_v17 = vmul.f32 1.442695, %v132_v16  ;;  %v130_v32 = vsub.f32 %v128_v26, %v129_v27  ;;  %v217_v47 = vld [vmem:[#allocation3 + $0x20] sm:$0xff]  ;;  %v218_v48 = vld [vmem:[#allocation3 + $0x28] sm:$0xff]  ;;  %v245_v51 = vld [vmem:[#allocation3 + $0x30] sm:$0xff] }
  0x2e   :  { %v221_v49 = vld [vmem:[#allocation6 + $0x20] sm:$0xff]  ;;  %v222_v50 = vld [vmem:[#allocation6 + $0x28] sm:$0xff]  ;;  %v168_v52 = vsub.f32 %v162_v39, %v166_v41  ;;  %v246_v54 = vld [vmem:[#allocation3 + $0x38] sm:$0xff]  ;;  %v195_v57 = vsub.f32 %v189_v43, %v193_v45  ;;  %v196_v58 = vsub.f32 %v190_v44, %v194_v46  ;;  %v172_v2 = vmul.f32 %v169_v53, %v169_v53 }
  0x2f   :  { %v114_v18 = vmul.f32 %v112_v14, %v107_v13  ;;  %v122_v19 = vmul.f32 %v120_v15, %v105_v11  ;;  %343 = vpow2.f32 %v133_v17  ;;  %v249_v55 = vld [vmem:[#allocation6 + $0x30] sm:$0xff]  ;;  %v250_v56 = vld [vmem:[#allocation6 + $0x38] sm:$0xff]  ;;  %v223_v59 = vsub.f32 %v217_v47, %v221_v49 }
  0x30   :  { %v224_v60 = vsub.f32 %v218_v48, %v222_v50  ;;  %v251_v63 = vsub.f32 %v245_v51, %v249_v55  ;;  %v252_v0 = vsub.f32 %v246_v54, %v250_v56  ;;  %v171_v1 = vmul.f32 %v168_v52, %v168_v52 }
  0x31   :  { %v123_v20 = vadd.f32 %v122_v19, %v114_v18  ;;  %v199_v3 = vmul.f32 %v195_v57, %v195_v57  ;;  %v200_v4 = vmul.f32 %v196_v58, %v196_v58  ;;  %v227_v5 = vmul.f32 %v223_v59, %v223_v59 }
  0x32   :  { %v228_v6 = vmul.f32 %v224_v60, %v224_v60  ;;  %v255_v7 = vmul.f32 %v251_v63, %v251_v63  ;;  %v256_v8 = vmul.f32 %v252_v0, %v252_v0 }
  0x33   :  { %v124_v21 = vmul.f32 1.442695, %v123_v20 }
  0x35   :  { %345 = vpow2.f32 %v124_v21 }
  0x39   :  { %v344_v22 = vpop.eup %343 }
  0x3a   :  { %v135_v23 = vadd.f32 1.0, %v344_v22  ;;  %v138_v24 = vmul.f32 -0.5, %v344_v22  ;;  %v141_v28 = vand.u32 2147483647, %v344_v22 }
  0x3c   :  { %347 = vlog2.f32 %v135_v23  ;;  %v139_v25 = vadd.f32 1.0, %v138_v24  ;;  %vm142_vm1 = vcmp.lt.f32.partialorder %v141_v28, 0.0004427343 }
  0x3e   :  { %v140_v30 = vmul.f32 %v344_v22, %v139_v25 }
  0x3f   :  { %v346_v29 = vpop.eup %345 }
  0x40   :  { %v127_v34 = vsel %vm126_vm0, 0.0, %v346_v29 }
  0x46   :  { %v348_v31 = vpop.eup %347 }
  0x47   :  { %v137_v33 = vmul.f32 0.6931472, %v348_v31 }
  0x49   :  { %v143_v35 = vsel %vm142_vm1, %v140_v30, %v137_v33 }
  0x4a   :  { %v144_v36 = vadd.f32 %v143_v35, %v130_v32 }
  0x4c   :  { %v145_v37 = vmul.f32 %v144_v36, %v127_v34 }
  0x4e   :  { %v147_v38 = vsel %vm146_vm2, %v145_v37, 0.0 }
  0x4f   :  { %148 = vadd.xlane.f32.xlu0 %v147_v38 }
  0xa8   :  { %v232_v61 = vpop.permute.xlu1 %231  ;;  %v176_v62 = vpop.permute.xlu0 %175 }
  0xa9   :  { %v178_v10 = vmul.f32 %v176_v62, %v171_v1  ;;  %v179_v11 = vmul.f32 %v176_v62, %v172_v2  ;;  %v234_v15 = vmul.f32 %v232_v61, %v227_v5  ;;  %v235_v16 = vmul.f32 %v232_v61, %v228_v6 }
  0xac   :  { %v204_v9 = vpop.permute.xlu0 %203  ;;  %v260_v14 = vpop.permute.xlu1 %259 }
  0xad   :  { %v206_v12 = vmul.f32 %v204_v9, %v199_v3  ;;  %v207_v13 = vmul.f32 %v204_v9, %v200_v4  ;;  %v262_v19 = vmul.f32 %v260_v14, %v255_v7  ;;  %v263_v20 = vmul.f32 %v260_v14, %v256_v8 }
  0xaf   :  { %v210_v17 = vadd.f32 %v206_v12, %v178_v10  ;;  %v211_v18 = vadd.f32 %v207_v13, %v179_v11 }
  0xb1   :  { %v238_v21 = vadd.f32 %v234_v15, %v210_v17  ;;  %v239_v22 = vadd.f32 %v235_v16, %v211_v18 }
  0xb3   :  { %v266_v23 = vadd.f32 %v262_v19, %v238_v21  ;;  %v267_v24 = vadd.f32 %v263_v20, %v239_v22 }
  0xb5   :  { %v275_v25 = vadd.f32 %v267_v24, %v266_v23 }
  0xb7   :  { %276 = vadd.xlane.f32.xlu1 %v275_v25 }
  0xdc   :  { %v149_v26 = vpop.xlane.xlu0 %148 }
  0xdd   :  { %v150_v27 = vrot.slane %v149_v26, 4 }
  0xdf   :  { %v151_v28 = vadd.f32 %v150_v27, %v149_v26 }
  0xe1   :  { %v152_v29 = vrot.slane %v151_v28, 2 }
  0xe3   :  { %v153_v30 = vadd.f32 %v152_v29, %v151_v28 }
  0xe5   :  { %v154_v31 = vrot.slane %v153_v30, 1 }
  0xe7   :  { %v155_v32 = vadd.f32 %v154_v31, %v153_v30 }
  0xe9   :  { %329 = vpush %v155_v32 }
 0x11a   :  { %s330_s0 = spop %329 }
 0x11b   :  { %158 = sst [smem:[#allocation8]] %s330_s0 }
 0x11c   :  { %402 = shalt.err (!%p399_p4)
}
 0x11d   :  { %s426_s20 = smov [#allocation8]   ;;  %s403_s25 = scalar_lea.hbm %s544_s7, 16 }
 0x11e   :  { %294 = dma.smem_to_hbm %s426_s20, 16, %s543_s6, [#allocation5]  }
 0x11f   :  { %p404_p5 = scmp.ne.s32.totalorder %s544_s7, %s403_s25  ;;  %p407_p6 = scmp.lt.u32.totalorder %s403_s25, %s544_s7 }
 0x121   :  { %p409_p7 = pnand %p407_p6, %p404_p5 }
 0x144   :  { %v277_v33 = vpop.xlane.xlu1 %276 }
 0x145   :  { %v278_v34 = vrot.slane %v277_v33, 4 }
 0x147   :  { %v279_v35 = vadd.f32 %v278_v34, %v277_v33 }
 0x149   :  { %v280_v36 = vrot.slane %v279_v35, 2 }
 0x14b   :  { %v281_v37 = vadd.f32 %v280_v36, %v279_v35 }
 0x14d   :  { %v282_v38 = vrot.slane %v281_v37, 1 }
 0x14f   :  { %v283_v39 = vadd.f32 %v282_v38, %v281_v37 }
 0x151   :  { %331 = vpush %v283_v39 }
 0x182   :  { %s332_s23 = spop %331 }
 0x183   :  { %286 = sst [smem:[#allocation9]] %s332_s23 }
 0x184   :  { %412 = shalt.err (!%p409_p7)
}
 0x185   :  { %s427_s29 = smov [#allocation9]  }
 0x186   :  { %302 = dma.smem_to_hbm %s427_s29, 16, %s544_s7, [#allocation10]  }
 0x187   :  { %417 = dma.done.wait [#allocation5], 16  }
 0x188   :  { %418 = vsyncadd [#allocation5], 4294967280 }
 0x189   :  { %419 = dma.done.wait [#allocation10], 16  }
 0x18a   :  { %420 = vsyncadd [#allocation10], 4294967280 }
 0x18b   :  { %309 = sfence }
 0x18c   :  { %310 = vsyncpa [#allocation4], 1 }
 0x18d   :  { %311 = vsyncpa [#allocation7], 1 }
 0x18e   :  { %312 = vsyncpa [#allocation5], 1 }
 0x18f   :  { %313 = vsyncpa [#allocation10], 1 }

</bundles_post_ra>
